<compile_context>
chip_gen: v6e
topology: v6e:2x2x1
jax: 0.10.0
libtpu: 0.0.40
codegen_flags: <defaults>
</compile_context>

<pallas_src>
import functools

import jax
import jax.numpy as jnp
from jax.experimental import pallas as pl
from jax.experimental.pallas import tpu as pltpu


_LANE = 128
_SUBLANE = 8


# ----------------------------------------------------------------------------
# Helpers
# ----------------------------------------------------------------------------
def _round_up(x, m):
    return (x + m - 1) // m * m


def _choose_batch_tile(m):
    """Large sublane-aligned tile; >=2 grid steps whenever the batch allows."""
    if m <= _SUBLANE:
        return _SUBLANE
    return min(512, _round_up((m + 1) // 2, _SUBLANE))


def _pad2d(a, rows, cols):
    return jnp.pad(a, ((0, rows - a.shape[0]), (0, cols - a.shape[1])))


# ----------------------------------------------------------------------------
# Fused Pallas kernels
# ----------------------------------------------------------------------------
def _vae_fused_kernel(*refs, n_seq1, n_seq2, dp, ep):
    """Full VAE forward on one batch tile.

    refs = [x, eps,
            (w, b) * n_seq1,      # encoder Linear+ReLU chain (padded)
            w_fc1, b_fc1,         # mu head
            w_fc2, b_fc2,         # logvar head
            (w, b) * n_seq2,      # decoder chain (last layer no ReLU)
            out]                  # lane-dense slab: rec | mu | std | logvar
    """
    it = iter(refs)
    x_ref = next(it)
    eps_ref = next(it)
    seq1 = [(next(it), next(it)) for _ in range(n_seq1)]
    fc1_w, fc1_b = next(it), next(it)
    fc2_w, fc2_b = next(it), next(it)
    seq2 = [(next(it), next(it)) for _ in range(n_seq2)]
    out_ref = next(it)

    wdt = seq1[0][0].dtype  # bf16 (or f32 if use_bf16=False)

    def lin(h_f32, w_ref, b_ref):
        # Elementwise math stays f32 (v5e-friendly); cast to the weight dtype
        # only to feed the MXU. Accumulate in f32.
        return jnp.dot(h_f32.astype(wdt), w_ref[...],
                       preferred_element_type=jnp.float32) + b_ref[...]

    # --- encoder: Linear + ReLU chain ---------------------------------------
    h = x_ref[...].astype(jnp.float32)
    for w, b in seq1:
        h = jnp.maximum(lin(h, w, b), 0.0)

    # --- fc1 / fc2 as two tile-aligned matmuls -------------------------------
    mu = lin(h, fc1_w, fc1_b)
    logvar = lin(h, fc2_w, fc2_b)

    # --- reparameterization (f32 elementwise) --------------------------------
    std = jnp.exp(0.5 * logvar)
    emb = eps_ref[...].astype(jnp.float32) * std + mu

    # --- decoder: Linear+ReLU chain, final Linear without ReLU ---------------
    out = emb
    for i, (w, b) in enumerate(seq2):
        out = lin(out, w, b)
        if i < n_seq2 - 1:
            out = jnp.maximum(out, 0.0)

    # --- single lane-dense output slab (all offsets are multiples of 128) ----
    out_ref[:, 0:dp] = out.astype(out_ref.dtype)
    out_ref[:, dp:dp + ep] = mu.astype(out_ref.dtype)
    out_ref[:, dp + ep:dp + 2 * ep] = std.astype(out_ref.dtype)
    out_ref[:, dp + 2 * ep:dp + 3 * ep] = logvar.astype(out_ref.dtype)


def _ae_fused_kernel(*refs, n_seq1, n_seq2):
    """Plain autoencoder forward (feature fed straight to decoder)."""
    it = iter(refs)
    x_ref = next(it)
    seq1 = [(next(it), next(it)) for _ in range(n_seq1)]
    seq2 = [(next(it), next(it)) for _ in range(n_seq2)]
    out_ref = next(it)

    wdt = seq1[0][0].dtype

    def lin(h_f32, w_ref, b_ref):
        return jnp.dot(h_f32.astype(wdt), w_ref[...],
                       preferred_element_type=jnp.float32) + b_ref[...]

    h = x_ref[...].astype(jnp.float32)
    for w, b in seq1:
        h = jnp.maximum(lin(h, w, b), 0.0)
    out = h
    for i, (w, b) in enumerate(seq2):
        out = lin(out, w, b)
        if i < n_seq2 - 1:
            out = jnp.maximum(out, 0.0)
    out_ref[...] = out.astype(out_ref.dtype)


# ----------------------------------------------------------------------------
# Wrapper: single pallas_call for the whole forward
# ----------------------------------------------------------------------------
def autoencoder_forward(params, x, eps=None, ae=False, use_bf16=True):
    m, data_dim = x.shape
    f32 = jnp.float32
    wdt = jnp.bfloat16 if use_bf16 else f32

    dp = _round_up(data_dim, _LANE)

    tb = _choose_batch_tile(m)
    mp = _round_up(m, tb)
    grid = (mp // tb,)

    # Zero-padded batch rows stay finite through exp() and are sliced away.
    x_p = _pad2d(x, mp, dp).astype(wdt)

    seq1 = params["seq1"]
    seq2 = params["seq2"]
    n1, n2 = len(seq1), len(seq2)

    weight_inputs, weight_specs = [], []

    def full_spec(shape):
        return pl.BlockSpec(shape, lambda i: (0, 0))

    def batch_spec(n_cols):
        return pl.BlockSpec((tb, n_cols), lambda i: (i, 0))

    def add_layer(w, b, in_pad, out_pad):
        # Zero-pad to (8,128)-aligned shapes; padded rows/cols keep the math
        # exact because the padded activation columns are always zero.
        wp = _pad2d(w, in_pad, out_pad).astype(wdt)
        bp = jnp.pad(b, (0, out_pad - b.shape[0])).reshape(1, -1).astype(f32)
        weight_inputs.extend([wp, bp])
        weight_specs.extend([full_spec(wp.shape), full_spec(bp.shape)])
        return out_pad

    # TODO(synk): if data_dim grows to realistic CTGAN sizes, re-budget VMEM
    # (drop tb on v7x's 64 MiB) instead of this fixed 32 MiB limit.
    compiler_params = pltpu.CompilerParams(
        dimension_semantics=("parallel",),
        vmem_limit_bytes=32 * 1024 * 1024,
    )

    if ae:
        # Same behaviour as the PyTorch module: only shape-consistent when
        # compress_dims[-1] == embedding_dim.
        assert seq1[-1][0].shape[1] == seq2[0][0].shape[0], (
            "ae=True requires compress_dims[-1] == embedding_dim")
        cur = dp
        for w, b in seq1:
            cur = add_layer(w, b, cur, _round_up(w.shape[1], _LANE))
        for w, b in seq2:
            cur = add_layer(w, b, cur, _round_up(w.shape[1], _LANE))
        assert cur == dp

        rec_p = pl.pallas_call(
            functools.partial(_ae_fused_kernel, n_seq1=n1, n_seq2=n2),
            out_shape=jax.ShapeDtypeStruct((mp, dp), f32),
            grid=grid,
            in_specs=[batch_spec(dp)] + weight_specs,
            out_specs=batch_spec(dp),
            compiler_params=compiler_params,
        )(x_p, *weight_inputs)
        return rec_p[:m, :data_dim], params["fc3"]

    assert eps is not None, "eps (randn_like(std)) is required when ae=False"
    emb_dim = eps.shape[1]
    ep = _round_up(emb_dim, _LANE)
    eps_p = _pad2d(eps, mp, ep).astype(wdt)

    cur = dp
    for w, b in seq1:
        cur = add_layer(w, b, cur, _round_up(w.shape[1], _LANE))
    add_layer(params["fc1"][0], params["fc1"][1], cur, ep)
    add_layer(params["fc2"][0], params["fc2"][1], cur, ep)
    cur = ep
    for w, b in seq2:
        cur = add_layer(w, b, cur, _round_up(w.shape[1], _LANE))
    assert cur == dp

    out_w = dp + 3 * ep
    out_p = pl.pallas_call(
        functools.partial(_vae_fused_kernel, n_seq1=n1, n_seq2=n2, dp=dp, ep=ep),
        out_shape=jax.ShapeDtypeStruct((mp, out_w), f32),
        grid=grid,
        in_specs=[batch_spec(dp), batch_spec(ep)] + weight_specs,
        out_specs=batch_spec(out_w),
        compiler_params=compiler_params,
    )(x_p, eps_p, *weight_inputs)

    rec = out_p[:m, :data_dim]
    mu = out_p[:m, dp:dp + emb_dim]
    std = out_p[:m, dp + ep:dp + ep + emb_dim]
    logvar = out_p[:m, dp + 2 * ep:dp + 2 * ep + emb_dim]
    return rec, mu, std, logvar, params["fc3"]


# ----------------------------------------------------------------------------
# Parameter init (matches PyTorch Linear default U(-1/sqrt(in), 1/sqrt(in)))
# ----------------------------------------------------------------------------
def _init_linear(key, fan_in, fan_out):
    k_w, k_b = jax.random.split(key)
    bound = 1.0 / jnp.sqrt(jnp.float32(fan_in))
    w = jax.random.uniform(k_w, (fan_in, fan_out), jnp.float32, -bound, bound)
    b = jax.random.uniform(k_b, (fan_out,), jnp.float32, -bound, bound)
    return w, b


def init_autoencoder_params(key, data_dim, compress_dims, embedding_dim,
                            decompress_dims, ae=False):
    params = {"seq1": [], "seq2": []}
    dim = data_dim
    for item in compress_dims:
        key, sub = jax.random.split(key)
        params["seq1"].append(_init_linear(sub, dim, item))
        dim = item
    if not ae:
        key, k1, k2 = jax.random.split(key, 3)
        params["fc1"] = _init_linear(k1, dim, embedding_dim)
        params["fc2"] = _init_linear(k2, dim, embedding_dim)
    dim = embedding_dim
    for item in decompress_dims:
        key, sub = jax.random.split(key)
        params["seq2"].append(_init_linear(sub, dim, item))
        dim = item
    key, sub = jax.random.split(key)
    params["seq2"].append(_init_linear(sub, dim, data_dim))  # final Linear, no ReLU
    params["fc3"] = jnp.ones((data_dim,), jnp.float32) * 0.1
    return params


# ----------------------------------------------------------------------------
# Pure-JAX reference (mimics the kernel's bf16 MXU feeding for tight checks)
# ----------------------------------------------------------------------------
def _ref_forward(params, x, eps=None, ae=False, use_bf16=True):
    wdt = jnp.bfloat16 if use_bf16 else jnp.float32

    def lin(h, w, b):
        return jnp.dot(h.astype(wdt).astype(jnp.float32),
                       w.astype(wdt).astype(jnp.float32),
                       precision=jax.lax.Precision.HIGHEST) + b

    h = x
    for w, b in params["seq1"]:
        h = jnp.maximum(lin(h, w, b), 0.0)

    def dec(z):
        out = z
        n = len(params["seq2"])
        for i, (w, b) in enumerate(params["seq2"]):
            out = lin(out, w, b)
            if i < n - 1:
                out = jnp.maximum(out, 0.0)
        return out

    if ae:
        return dec(h), params["fc3"]
    mu = lin(h, *params["fc1"])
    logvar = lin(h, *params["fc2"])
    std = jnp.exp(0.5 * logvar)
    emb = eps.astype(wdt).astype(jnp.float32) * std + mu
    return dec(emb), mu, std, logvar, params["fc3"]


# ----------------------------------------------------------------------------
if __name__ == "__main__":
    data_dim = 16
    # compress_dims[-1] == embedding_dim so the ae=True branch (which feeds
    # `feature` straight into seq2, exactly like the PyTorch module) is valid.
    compress_dims = (32, 8)
    embedding_dim = 8
    decompress_dims = (32, 32)

    root = jax.random.PRNGKey(0)
    k_params, k_x, k_eps, k_x2, k_eps2 = jax.random.split(root, 5)

    params = init_autoencoder_params(
        k_params, data_dim, compress_dims, embedding_dim, decompress_dims)

    # --- VAE branch, small batch (single grid step) --------------------------
    batch = 2
    x = jax.random.normal(k_x, (batch, data_dim), jnp.float32)
    eps = jax.random.normal(k_eps, (batch, embedding_dim), jnp.float32)

    rec, mu, std, logvar, sigmas = autoencoder_forward(params, x, eps, ae=False)
    jax.block_until_ready((rec, mu, std, logvar, sigmas))

    rec_r, mu_r, std_r, logvar_r, _ = _ref_forward(params, x, eps, ae=False)
    assert bool(jnp.allclose(rec, rec_r, rtol=1e-3, atol=1e-3))
    assert bool(jnp.allclose(mu, mu_r, rtol=1e-3, atol=1e-3))
    assert bool(jnp.allclose(std, std_r, rtol=1e-3, atol=1e-3))
    assert bool(jnp.allclose(logvar, logvar_r, rtol=1e-3, atol=1e-3))

    # --- VAE branch, non-tile-divisible batch (2-step grid + batch padding) --
    batch2 = 300
    x2 = jax.random.normal(k_x2, (batch2, data_dim), jnp.float32)
    eps2 = jax.random.normal(k_eps2, (batch2, embedding_dim), jnp.float32)
    out2 = autoencoder_forward(params, x2, eps2, ae=False)
    jax.block_until_ready(out2)
    ref2 = _ref_forward(params, x2, eps2, ae=False)
    for a, b in zip(out2[:4], ref2[:4]):
        assert a.shape == b.shape
        assert bool(jnp.allclose(a, b, rtol=1e-3, atol=1e-3))

    # --- plain autoencoder branch (ae=True) -----------------------------------
    rec_ae, sigmas_ae = autoencoder_forward(params, x, ae=True)
    jax.block_until_ready((rec_ae, sigmas_ae))
    rec_ae_r, _ = _ref_forward(params, x, ae=True)
    assert bool(jnp.allclose(rec_ae, rec_ae_r, rtol=1e-3, atol=1e-3))

    assert rec.shape == (batch, data_dim)
    assert mu.shape == (batch, embedding_dim)
    assert std.shape == (batch, embedding_dim)
    assert logvar.shape == (batch, embedding_dim)
    assert sigmas.shape == (data_dim,)
    assert rec_ae.shape == (batch, data_dim)

    print("KERNEL_OK")
</pallas_src>

<mosaic_0001>
module attributes {stable_mosaic.version = 11 : i64} {
  func.func @_vae_fused_kernel(%arg0: i32, %arg1: memref<8x128xbf16, #tpu.memory_space<vmem>>, %arg2: memref<8x128xbf16, #tpu.memory_space<vmem>>, %arg3: memref<128x128xbf16, #tpu.memory_space<vmem>>, %arg4: memref<1x128xf32, #tpu.memory_space<vmem>>, %arg5: memref<128x128xbf16, #tpu.memory_space<vmem>>, %arg6: memref<1x128xf32, #tpu.memory_space<vmem>>, %arg7: memref<128x128xbf16, #tpu.memory_space<vmem>>, %arg8: memref<1x128xf32, #tpu.memory_space<vmem>>, %arg9: memref<128x128xbf16, #tpu.memory_space<vmem>>, %arg10: memref<1x128xf32, #tpu.memory_space<vmem>>, %arg11: memref<128x128xbf16, #tpu.memory_space<vmem>>, %arg12: memref<1x128xf32, #tpu.memory_space<vmem>>, %arg13: memref<128x128xbf16, #tpu.memory_space<vmem>>, %arg14: memref<1x128xf32, #tpu.memory_space<vmem>>, %arg15: memref<128x128xbf16, #tpu.memory_space<vmem>>, %arg16: memref<1x128xf32, #tpu.memory_space<vmem>>, %arg17: memref<8x512xf32, #tpu.memory_space<vmem>>) attributes {dimension_semantics = [#tpu.dimension_semantics<parallel>], iteration_bounds = array<i64: 1>, scalar_prefetch = 0 : i64, scratch_operands = 0 : i64, tpu.core_type = #tpu.core_type<tc>, window_params = [{transform_indices = @transform_0, window_bounds = array<i64: 8, 128>}, {transform_indices = @transform_1, window_bounds = array<i64: 8, 128>}, {pipeline_mode = #tpu.pipeline_mode<synchronous>, transform_indices = @transform_2, window_bounds = array<i64: 128, 128>}, {pipeline_mode = #tpu.pipeline_mode<synchronous>, transform_indices = @transform_3, window_bounds = array<i64: 1, 128>}, {pipeline_mode = #tpu.pipeline_mode<synchronous>, transform_indices = @transform_4, window_bounds = array<i64: 128, 128>}, {pipeline_mode = #tpu.pipeline_mode<synchronous>, transform_indices = @transform_5, window_bounds = array<i64: 1, 128>}, {pipeline_mode = #tpu.pipeline_mode<synchronous>, transform_indices = @transform_6, window_bounds = array<i64: 128, 128>}, {pipeline_mode = #tpu.pipeline_mode<synchronous>, transform_indices = @transform_7, window_bounds = array<i64: 1, 128>}, {pipeline_mode = #tpu.pipeline_mode<synchronous>, transform_indices = @transform_8, window_bounds = array<i64: 128, 128>}, {pipeline_mode = #tpu.pipeline_mode<synchronous>, transform_indices = @transform_9, window_bounds = array<i64: 1, 128>}, {pipeline_mode = #tpu.pipeline_mode<synchronous>, transform_indices = @transform_10, window_bounds = array<i64: 128, 128>}, {pipeline_mode = #tpu.pipeline_mode<synchronous>, transform_indices = @transform_11, window_bounds = array<i64: 1, 128>}, {pipeline_mode = #tpu.pipeline_mode<synchronous>, transform_indices = @transform_12, window_bounds = array<i64: 128, 128>}, {pipeline_mode = #tpu.pipeline_mode<synchronous>, transform_indices = @transform_13, window_bounds = array<i64: 1, 128>}, {pipeline_mode = #tpu.pipeline_mode<synchronous>, transform_indices = @transform_14, window_bounds = array<i64: 128, 128>}, {pipeline_mode = #tpu.pipeline_mode<synchronous>, transform_indices = @transform_15, window_bounds = array<i64: 1, 128>}, {transform_indices = @transform_16, window_bounds = array<i64: 8, 512>}]} {
    %c0 = arith.constant 0 : index
    %c0_0 = arith.constant 0 : index
    %0 = vector.load %arg1[%c0, %c0_0] : memref<8x128xbf16, #tpu.memory_space<vmem>>, vector<8x128xbf16>
    %1 = arith.extf %0 : vector<8x128xbf16> to vector<8x128xf32>
    %2 = arith.truncf %1 : vector<8x128xf32> to vector<8x128xbf16>
    %c0_1 = arith.constant 0 : index
    %c0_2 = arith.constant 0 : index
    %3 = vector.load %arg3[%c0_1, %c0_2] : memref<128x128xbf16, #tpu.memory_space<vmem>>, vector<128x128xbf16>
    %cst = arith.constant dense<0.000000e+00> : vector<8x128xf32>
    %4 = tpu.matmul %2, %3, %cst {dimension_numbers = #tpu.dot_dimension_numbers<[1], [0], [0], [1], [0, 0, 1, 1], [], []>} : vector<8x128xbf16>, vector<128x128xbf16>, vector<8x128xf32> -> vector<8x128xf32>
    %c0_3 = arith.constant 0 : index
    %c0_4 = arith.constant 0 : index
    %5 = vector.load %arg4[%c0_3, %c0_4] : memref<1x128xf32, #tpu.memory_space<vmem>>, vector<1x128xf32>
    %6 = vector.broadcast %5 : vector<1x128xf32> to vector<8x128xf32>
    %7 = arith.addf %4, %6 : vector<8x128xf32>
    %cst_5 = arith.constant 0.000000e+00 : f32
    %8 = vector.broadcast %cst_5 : f32 to vector<8x128xf32>
    %9 = arith.maximumf %7, %8 : vector<8x128xf32>
    %10 = arith.truncf %9 : vector<8x128xf32> to vector<8x128xbf16>
    %c0_6 = arith.constant 0 : index
    %c0_7 = arith.constant 0 : index
    %11 = vector.load %arg5[%c0_6, %c0_7] : memref<128x128xbf16, #tpu.memory_space<vmem>>, vector<128x128xbf16>
    %cst_8 = arith.constant dense<0.000000e+00> : vector<8x128xf32>
    %12 = tpu.matmul %10, %11, %cst_8 {dimension_numbers = #tpu.dot_dimension_numbers<[1], [0], [0], [1], [0, 0, 1, 1], [], []>} : vector<8x128xbf16>, vector<128x128xbf16>, vector<8x128xf32> -> vector<8x128xf32>
    %c0_9 = arith.constant 0 : index
    %c0_10 = arith.constant 0 : index
    %13 = vector.load %arg6[%c0_9, %c0_10] : memref<1x128xf32, #tpu.memory_space<vmem>>, vector<1x128xf32>
    %14 = vector.broadcast %13 : vector<1x128xf32> to vector<8x128xf32>
    %15 = arith.addf %12, %14 : vector<8x128xf32>
    %cst_11 = arith.constant 0.000000e+00 : f32
    %16 = vector.broadcast %cst_11 : f32 to vector<8x128xf32>
    %17 = arith.maximumf %15, %16 : vector<8x128xf32>
    %18 = arith.truncf %17 : vector<8x128xf32> to vector<8x128xbf16>
    %c0_12 = arith.constant 0 : index
    %c0_13 = arith.constant 0 : index
    %19 = vector.load %arg7[%c0_12, %c0_13] : memref<128x128xbf16, #tpu.memory_space<vmem>>, vector<128x128xbf16>
    %cst_14 = arith.constant dense<0.000000e+00> : vector<8x128xf32>
    %20 = tpu.matmul %18, %19, %cst_14 {dimension_numbers = #tpu.dot_dimension_numbers<[1], [0], [0], [1], [0, 0, 1, 1], [], []>} : vector<8x128xbf16>, vector<128x128xbf16>, vector<8x128xf32> -> vector<8x128xf32>
    %c0_15 = arith.constant 0 : index
    %c0_16 = arith.constant 0 : index
    %21 = vector.load %arg8[%c0_15, %c0_16] : memref<1x128xf32, #tpu.memory_space<vmem>>, vector<1x128xf32>
    %22 = vector.broadcast %21 : vector<1x128xf32> to vector<8x128xf32>
    %23 = arith.addf %20, %22 : vector<8x128xf32>
    %24 = arith.truncf %17 : vector<8x128xf32> to vector<8x128xbf16>
    %c0_17 = arith.constant 0 : index
    %c0_18 = arith.constant 0 : index
    %25 = vector.load %arg9[%c0_17, %c0_18] : memref<128x128xbf16, #tpu.memory_space<vmem>>, vector<128x128xbf16>
    %cst_19 = arith.constant dense<0.000000e+00> : vector<8x128xf32>
    %26 = tpu.matmul %24, %25, %cst_19 {dimension_numbers = #tpu.dot_dimension_numbers<[1], [0], [0], [1], [0, 0, 1, 1], [], []>} : vector<8x128xbf16>, vector<128x128xbf16>, vector<8x128xf32> -> vector<8x128xf32>
    %c0_20 = arith.constant 0 : index
    %c0_21 = arith.constant 0 : index
    %27 = vector.load %arg10[%c0_20, %c0_21] : memref<1x128xf32, #tpu.memory_space<vmem>>, vector<1x128xf32>
    %28 = vector.broadcast %27 : vector<1x128xf32> to vector<8x128xf32>
    %29 = arith.addf %26, %28 : vector<8x128xf32>
    %cst_22 = arith.constant 5.000000e-01 : f32
    %30 = vector.broadcast %cst_22 : f32 to vector<8x128xf32>
    %31 = arith.mulf %30, %29 : vector<8x128xf32>
    %32 = math.exp %31 : vector<8x128xf32>
    %c0_23 = arith.constant 0 : index
    %c0_24 = arith.constant 0 : index
    %33 = vector.load %arg2[%c0_23, %c0_24] : memref<8x128xbf16, #tpu.memory_space<vmem>>, vector<8x128xbf16>
    %34 = arith.extf %33 : vector<8x128xbf16> to vector<8x128xf32>
    %35 = arith.mulf %34, %32 : vector<8x128xf32>
    %36 = arith.addf %35, %23 : vector<8x128xf32>
    %37 = arith.truncf %36 : vector<8x128xf32> to vector<8x128xbf16>
    %c0_25 = arith.constant 0 : index
    %c0_26 = arith.constant 0 : index
    %38 = vector.load %arg11[%c0_25, %c0_26] : memref<128x128xbf16, #tpu.memory_space<vmem>>, vector<128x128xbf16>
    %cst_27 = arith.constant dense<0.000000e+00> : vector<8x128xf32>
    %39 = tpu.matmul %37, %38, %cst_27 {dimension_numbers = #tpu.dot_dimension_numbers<[1], [0], [0], [1], [0, 0, 1, 1], [], []>} : vector<8x128xbf16>, vector<128x128xbf16>, vector<8x128xf32> -> vector<8x128xf32>
    %c0_28 = arith.constant 0 : index
    %c0_29 = arith.constant 0 : index
    %40 = vector.load %arg12[%c0_28, %c0_29] : memref<1x128xf32, #tpu.memory_space<vmem>>, vector<1x128xf32>
    %41 = vector.broadcast %40 : vector<1x128xf32> to vector<8x128xf32>
    %42 = arith.addf %39, %41 : vector<8x128xf32>
    %cst_30 = arith.constant 0.000000e+00 : f32
    %43 = vector.broadcast %cst_30 : f32 to vector<8x128xf32>
    %44 = arith.maximumf %42, %43 : vector<8x128xf32>
    %45 = arith.truncf %44 : vector<8x128xf32> to vector<8x128xbf16>
    %c0_31 = arith.constant 0 : index
    %c0_32 = arith.constant 0 : index
    %46 = vector.load %arg13[%c0_31, %c0_32] : memref<128x128xbf16, #tpu.memory_space<vmem>>, vector<128x128xbf16>
    %cst_33 = arith.constant dense<0.000000e+00> : vector<8x128xf32>
    %47 = tpu.matmul %45, %46, %cst_33 {dimension_numbers = #tpu.dot_dimension_numbers<[1], [0], [0], [1], [0, 0, 1, 1], [], []>} : vector<8x128xbf16>, vector<128x128xbf16>, vector<8x128xf32> -> vector<8x128xf32>
    %c0_34 = arith.constant 0 : index
    %c0_35 = arith.constant 0 : index
    %48 = vector.load %arg14[%c0_34, %c0_35] : memref<1x128xf32, #tpu.memory_space<vmem>>, vector<1x128xf32>
    %49 = vector.broadcast %48 : vector<1x128xf32> to vector<8x128xf32>
    %50 = arith.addf %47, %49 : vector<8x128xf32>
    %cst_36 = arith.constant 0.000000e+00 : f32
    %51 = vector.broadcast %cst_36 : f32 to vector<8x128xf32>
    %52 = arith.maximumf %50, %51 : vector<8x128xf32>
    %53 = arith.truncf %52 : vector<8x128xf32> to vector<8x128xbf16>
    %c0_37 = arith.constant 0 : index
    %c0_38 = arith.constant 0 : index
    %54 = vector.load %arg15[%c0_37, %c0_38] : memref<128x128xbf16, #tpu.memory_space<vmem>>, vector<128x128xbf16>
    %cst_39 = arith.constant dense<0.000000e+00> : vector<8x128xf32>
    %55 = tpu.matmul %53, %54, %cst_39 {dimension_numbers = #tpu.dot_dimension_numbers<[1], [0], [0], [1], [0, 0, 1, 1], [], []>} : vector<8x128xbf16>, vector<128x128xbf16>, vector<8x128xf32> -> vector<8x128xf32>
    %c0_40 = arith.constant 0 : index
    %c0_41 = arith.constant 0 : index
    %56 = vector.load %arg16[%c0_40, %c0_41] : memref<1x128xf32, #tpu.memory_space<vmem>>, vector<1x128xf32>
    %57 = vector.broadcast %56 : vector<1x128xf32> to vector<8x128xf32>
    %58 = arith.addf %55, %57 : vector<8x128xf32>
    %c0_42 = arith.constant 0 : index
    %c0_43 = arith.constant 0 : index
    %59 = vector.load %arg17[%c0_42, %c0_43] : memref<8x512xf32, #tpu.memory_space<vmem>>, vector<8x128xf32>
    tpu.vector_store %arg17[%c0_42, %c0_43], %58 {strides = array<i32>} : memref<8x512xf32, #tpu.memory_space<vmem>>, vector<8x128xf32>,
    %c0_44 = arith.constant 0 : index
    %c128 = arith.constant 128 : index
    %60 = vector.load %arg17[%c0_44, %c128] : memref<8x512xf32, #tpu.memory_space<vmem>>, vector<8x128xf32>
    tpu.vector_store %arg17[%c0_44, %c128], %23 {strides = array<i32>} : memref<8x512xf32, #tpu.memory_space<vmem>>, vector<8x128xf32>,
    %c0_45 = arith.constant 0 : index
    %c256 = arith.constant 256 : index
    %61 = vector.load %arg17[%c0_45, %c256] : memref<8x512xf32, #tpu.memory_space<vmem>>, vector<8x128xf32>
    tpu.vector_store %arg17[%c0_45, %c256], %32 {strides = array<i32>} : memref<8x512xf32, #tpu.memory_space<vmem>>, vector<8x128xf32>,
    %c0_46 = arith.constant 0 : index
    %c384 = arith.constant 384 : index
    %62 = vector.load %arg17[%c0_46, %c384] : memref<8x512xf32, #tpu.memory_space<vmem>>, vector<8x128xf32>
    tpu.vector_store %arg17[%c0_46, %c384], %29 {strides = array<i32>} : memref<8x512xf32, #tpu.memory_space<vmem>>, vector<8x128xf32>,
    return
  }
  func.func @transform_0(%arg0: i32) -> (i32, i32) {
    %c0_i32 = arith.constant 0 : i32
    %c0_i32_0 = arith.constant 0 : i32
    return %arg0, %c0_i32 : i32, i32
  }
  func.func @transform_1(%arg0: i32) -> (i32, i32) {
    %c0_i32 = arith.constant 0 : i32
    %c0_i32_0 = arith.constant 0 : i32
    return %arg0, %c0_i32 : i32, i32
  }
  func.func @transform_2(%arg0: i32) -> (i32, i32) {
    %c0_i32 = arith.constant 0 : i32
    %c0_i32_0 = arith.constant 0 : i32
    %c0_i32_1 = arith.constant 0 : i32
    return %c0_i32, %c0_i32_0 : i32, i32
  }
  func.func @transform_3(%arg0: i32) -> (i32, i32) {
    %c0_i32 = arith.constant 0 : i32
    %c0_i32_0 = arith.constant 0 : i32
    %c0_i32_1 = arith.constant 0 : i32
    return %c0_i32, %c0_i32_0 : i32, i32
  }
  func.func @transform_4(%arg0: i32) -> (i32, i32) {
    %c0_i32 = arith.constant 0 : i32
    %c0_i32_0 = arith.constant 0 : i32
    %c0_i32_1 = arith.constant 0 : i32
    return %c0_i32, %c0_i32_0 : i32, i32
  }
  func.func @transform_5(%arg0: i32) -> (i32, i32) {
    %c0_i32 = arith.constant 0 : i32
    %c0_i32_0 = arith.constant 0 : i32
    %c0_i32_1 = arith.constant 0 : i32
    return %c0_i32, %c0_i32_0 : i32, i32
  }
  func.func @transform_6(%arg0: i32) -> (i32, i32) {
    %c0_i32 = arith.constant 0 : i32
    %c0_i32_0 = arith.constant 0 : i32
    %c0_i32_1 = arith.constant 0 : i32
    return %c0_i32, %c0_i32_0 : i32, i32
  }
  func.func @transform_7(%arg0: i32) -> (i32, i32) {
    %c0_i32 = arith.constant 0 : i32
    %c0_i32_0 = arith.constant 0 : i32
    %c0_i32_1 = arith.constant 0 : i32
    return %c0_i32, %c0_i32_0 : i32, i32
  }
  func.func @transform_8(%arg0: i32) -> (i32, i32) {
    %c0_i32 = arith.constant 0 : i32
    %c0_i32_0 = arith.constant 0 : i32
    %c0_i32_1 = arith.constant 0 : i32
    return %c0_i32, %c0_i32_0 : i32, i32
  }
  func.func @transform_9(%arg0: i32) -> (i32, i32) {
    %c0_i32 = arith.constant 0 : i32
    %c0_i32_0 = arith.constant 0 : i32
    %c0_i32_1 = arith.constant 0 : i32
    return %c0_i32, %c0_i32_0 : i32, i32
  }
  func.func @transform_10(%arg0: i32) -> (i32, i32) {
    %c0_i32 = arith.constant 0 : i32
    %c0_i32_0 = arith.constant 0 : i32
    %c0_i32_1 = arith.constant 0 : i32
    return %c0_i32, %c0_i32_0 : i32, i32
  }
  func.func @transform_11(%arg0: i32) -> (i32, i32) {
    %c0_i32 = arith.constant 0 : i32
    %c0_i32_0 = arith.constant 0 : i32
    %c0_i32_1 = arith.constant 0 : i32
    return %c0_i32, %c0_i32_0 : i32, i32
  }
  func.func @transform_12(%arg0: i32) -> (i32, i32) {
    %c0_i32 = arith.constant 0 : i32
    %c0_i32_0 = arith.constant 0 : i32
    %c0_i32_1 = arith.constant 0 : i32
    return %c0_i32, %c0_i32_0 : i32, i32
  }
  func.func @transform_13(%arg0: i32) -> (i32, i32) {
    %c0_i32 = arith.constant 0 : i32
    %c0_i32_0 = arith.constant 0 : i32
    %c0_i32_1 = arith.constant 0 : i32
    return %c0_i32, %c0_i32_0 : i32, i32
  }
  func.func @transform_14(%arg0: i32) -> (i32, i32) {
    %c0_i32 = arith.constant 0 : i32
    %c0_i32_0 = arith.constant 0 : i32
    %c0_i32_1 = arith.constant 0 : i32
    return %c0_i32, %c0_i32_0 : i32, i32
  }
  func.func @transform_15(%arg0: i32) -> (i32, i32) {
    %c0_i32 = arith.constant 0 : i32
    %c0_i32_0 = arith.constant 0 : i32
    %c0_i32_1 = arith.constant 0 : i32
    return %c0_i32, %c0_i32_0 : i32, i32
  }
  func.func @transform_16(%arg0: i32) -> (i32, i32) {
    %c0_i32 = arith.constant 0 : i32
    %c0_i32_0 = arith.constant 0 : i32
    return %arg0, %c0_i32 : i32, i32
  }
}

</mosaic_0001>

<bundles_post_ra>
// kernel: tpu_custom_call.1
= control target key start
LH: loop header
LB: loop body
LE: loop exit
PB: predicated region body
PF: predicated region fallthrough
CT: control target
= control target key end

     0   :  { %s1781_s0 = inlined_call_operand.hbm [shape: bf16[8,128], index: 0, kind: input, shape index: {}]   ;;  %s1782_s1 = inlined_call_operand.hbm [shape: bf16[8,128], index: 1, kind: input, shape index: {}]   ;;  %s1783_s2 = inlined_call_operand.hbm [shape: bf16[128,128], index: 2, kind: input, shape index: {}]   ;;  %s1784_s3 = inlined_call_operand.vmem [shape: f32[1,128], index: 3, kind: input, shape index: {}]   ;;  %s1785_s4 = inlined_call_operand.hbm [shape: bf16[128,128], index: 4, kind: input, shape index: {}]   ;;  %s1786_s5 = inlined_call_operand.vmem [shape: f32[1,128], index: 5, kind: input, shape index: {}]   ;;  %s1787_s6 = inlined_call_operand.hbm [shape: bf16[128,128], index: 6, kind: input, shape index: {}]   ;;  %s1788_s7 = inlined_call_operand.vmem [shape: f32[1,128], index: 7, kind: input, shape index: {}]   ;;  %s1789_s8 = inlined_call_operand.hbm [shape: bf16[128,128], index: 8, kind: input, shape index: {}]   ;;  %s1790_s9 = inlined_call_operand.vmem [shape: f32[1,128], index: 9, kind: input, shape index: {}]   ;;  %s1791_s10 = inlined_call_operand.hbm [shape: bf16[128,128], index: 10, kind: input, shape index: {}]   ;;  %s1792_s11 = inlined_call_operand.vmem [shape: f32[1,128], index: 11, kind: input, shape index: {}]   ;;  %s1793_s12 = inlined_call_operand.hbm [shape: bf16[128,128], index: 12, kind: input, shape index: {}]   ;;  %s1794_s13 = inlined_call_operand.vmem [shape: f32[1,128], index: 13, kind: input, shape index: {}]   ;;  %s1795_s14 = inlined_call_operand.hbm [shape: bf16[128,128], index: 14, kind: input, shape index: {}]   ;;  %s1796_s15 = inlined_call_operand.vmem [shape: f32[1,128], index: 15, kind: input, shape index: {}]   ;;  %s1797_s16 = inlined_call_operand.hbm [shape: f32[8,512], index: 16, kind: output, shape index: {}]  }
   0x1   :  { %1798 = sst [smem:[#allocation24_spill]] %s1781_s0 }
   0x2   :  { %21 = vsyncpa [#allocation3], 0 }
   0x3   :  { %22 = vsyncpa [#allocation6], 0 }
   0x4   :  { %23 = vsyncpa [#allocation9], 0 }
   0x5   :  { %24 = vsyncpa [#allocation12], 0 }
   0x6   :  { %25 = vsyncpa [#allocation15], 0 }
   0x7   :  { %26 = vsyncpa [#allocation4], 0  ;;  %s1540_s21 = smov [#allocation5]  }
   0x8   :  { %s43_s22 = sshll.u32 %s1540_s21, 4  ;;  %s44_s22 = int_to_ptr.vmem [resolvable:$true] %s43_s22 }
   0x9   :  { %s1336_s23 = scalar_lea.vmem %s44_s22, 64  ;;  %p1341_p1 = scmp.lt.s32.totalorder %s44_s22, %s44_s22 }
   0xa   :  { %p1337_p0 = scmp.ne.s32.totalorder %s44_s22, %s1336_s23  ;;  %p1342_p2 = scmp.lt.s32.totalorder %s1336_s23, %s1336_s23 }
   0xc   :  { %p1343_p3 = por %p1342_p2, %p1341_p1 }
   0xe   :  { %p1344_p4 = pnand %p1343_p3, %p1337_p0 }
  0x10   :  { %1347 = shalt.err (!%p1344_p4)
}
  0x11   :  { %46 = dma.hbm_to_vmem [thread:$0]  %s1782_s1, 64, %s44_s22, [#allocation6]  }
  0x12   :  { %s1541_s26 = smov [#allocation8]   ;;  %s1542_s28 = smov [#allocation11]  }
  0x13   :  { %s66_s27 = sshll.u32 %s1541_s26, 4  ;;  %s94_s29 = sshll.u32 %s1542_s28, 4  ;;  %s67_s27 = int_to_ptr.vmem [resolvable:$true] %s66_s27  ;;  %s95_s29 = int_to_ptr.vmem [resolvable:$true] %s94_s29 }
  0x14   :  { %s1356_s30 = scalar_lea.vmem %s67_s27, 1024  ;;  %p1361_p6 = scmp.lt.s32.totalorder %s67_s27, %s67_s27 }
  0x15   :  { %p1357_p5 = scmp.ne.s32.totalorder %s67_s27, %s1356_s30  ;;  %p1362_p7 = scmp.lt.s32.totalorder %s1356_s30, %s1356_s30 }
  0x17   :  { %p1363_p8 = por %p1362_p7, %p1361_p6 }
  0x19   :  { %p1364_p9 = pnand %p1363_p8, %p1357_p5 }
  0x1b   :  { %1367 = shalt.err (!%p1364_p9)
}
  0x1c   :  { %s1543_s0 = smov 64   ;;  %s1544_s17 = smov 4  }
  0x1d   :  { %72 = dma.hbm_to_vmem [thread:$0]  %s1785_s4, 1024, %s67_s27, [#allocation9], %s1543_s0, %s1543_s0, %s1544_s17  }
  0x1e   :  { %s1376_s1 = scalar_lea.vmem %s95_s29, 1024  ;;  %p1381_p11 = scmp.lt.s32.totalorder %s95_s29, %s95_s29 }
  0x1f   :  { %p1377_p10 = scmp.ne.s32.totalorder %s95_s29, %s1376_s1  ;;  %p1382_p12 = scmp.lt.s32.totalorder %s1376_s1, %s1376_s1 }
  0x21   :  { %p1383_p13 = por %p1382_p12, %p1381_p11 }
  0x23   :  { %p1384_p0 = pnand %p1383_p13, %p1377_p10 }
  0x25   :  { %1387 = shalt.err (!%p1384_p0)
}
  0x26   :  { %100 = dma.hbm_to_vmem [thread:$0]  %s1789_s8, 1024, %s95_s29, [#allocation12], %s1543_s0, %s1543_s0, %s1544_s17  }
  0x27   :  { %s1545_s22 = smov [#allocation14]   ;;  %s1546_s24 = smov [#allocation2]  }
  0x28   :  { %s122_s23 = sshll.u32 %s1545_s22, 4  ;;  %s33_s4 = sshll.u32 %s1546_s24, 4  ;;  %s123_s23 = int_to_ptr.vmem [resolvable:$true] %s122_s23  ;;  %s34_s4 = int_to_ptr.vmem [resolvable:$true] %s33_s4 }
  0x29   :  { %s1396_s25 = scalar_lea.vmem %s123_s23, 1024  ;;  %p1401_p2 = scmp.lt.s32.totalorder %s123_s23, %s123_s23 }
  0x2a   :  { %p1397_p1 = scmp.ne.s32.totalorder %s123_s23, %s1396_s25  ;;  %p1402_p3 = scmp.lt.s32.totalorder %s1396_s25, %s1396_s25 }
  0x2c   :  { %p1403_p4 = por %p1402_p3, %p1401_p2 }
  0x2e   :  { %p1404_p5 = pnand %p1403_p4, %p1397_p1 }
  0x30   :  { %1407 = shalt.err (!%p1404_p5)
}
  0x31   :  { %128 = dma.hbm_to_vmem [thread:$0]  %s1793_s12, 1024, %s123_s23, [#allocation15], %s1543_s0, %s1543_s0, %s1544_s17  }
  0x32   :  { %s1416_s8 = scalar_lea.vmem %s34_s4, 64  ;;  %p1421_p7 = scmp.lt.s32.totalorder %s34_s4, %s34_s4 }
  0x33   :  { %p1417_p6 = scmp.ne.s32.totalorder %s34_s4, %s1416_s8  ;;  %p1422_p8 = scmp.lt.s32.totalorder %s1416_s8, %s1416_s8 }
  0x35   :  { %p1423_p9 = por %p1422_p8, %p1421_p7 }
  0x37   :  { %p1424_p10 = pnand %p1423_p9, %p1417_p6 }
  0x39   :  { %1427 = shalt.err (!%p1424_p10)
}
  0x3a   :  { %s1799_s30 = sld [smem:[#allocation24_spill]]  ;;  %s1547_s18 = smov [#allocation7]  }
  0x3b   :  { %s52_s19 = sshll.u32 %s1547_s18, 4  ;;  %s1548_s1 = smov [#allocation10]   ;;  %s53_s19 = int_to_ptr.vmem [resolvable:$true] %s52_s19 }
  0x3c   :  { %s80_s20 = sshll.u32 %s1548_s1, 4  ;;  %s1436_s21 = scalar_lea.vmem %s53_s19, 1024  ;;  %s81_s20 = int_to_ptr.vmem [resolvable:$true] %s80_s20 }
  0x3d   :  { %p1437_p11 = scmp.ne.s32.totalorder %s53_s19, %s1436_s21  ;;  %p1441_p12 = scmp.lt.s32.totalorder %s53_s19, %s53_s19 }
  0x3e   :  { %p1442_p13 = scmp.lt.s32.totalorder %s1436_s21, %s1436_s21 }
  0x40   :  { %36 = dma.hbm_to_vmem [thread:$0]  %s1799_s30, 64, %s34_s4, [#allocation3]  }
  0x41   :  { %p1443_p0 = por %p1442_p13, %p1441_p12 }
  0x43   :  { %p1444_p1 = pnand %p1443_p0, %p1437_p11 }
  0x45   :  { %1447 = shalt.err (!%p1444_p1)
}
  0x46   :  { %58 = dma.hbm_to_vmem [thread:$0]  %s1783_s2, 1024, %s53_s19, [#allocation6], %s1543_s0, %s1543_s0, %s1544_s17  }
  0x47   :  { %s1456_s23 = scalar_lea.vmem %s81_s20, 1024  ;;  %p1461_p3 = scmp.lt.s32.totalorder %s81_s20, %s81_s20 }
  0x48   :  { %p1457_p2 = scmp.ne.s32.totalorder %s81_s20, %s1456_s23  ;;  %p1462_p4 = scmp.lt.s32.totalorder %s1456_s23, %s1456_s23 }
  0x4a   :  { %p1463_p5 = por %p1462_p4, %p1461_p3 }
  0x4c   :  { %p1464_p6 = pnand %p1463_p5, %p1457_p2 }
  0x4e   :  { %1467 = shalt.err (!%p1464_p6)
}
  0x4f   :  { %86 = dma.hbm_to_vmem [thread:$0]  %s1787_s6, 1024, %s81_s20, [#allocation9], %s1543_s0, %s1543_s0, %s1544_s17  }
  0x50   :  { %s1549_s25 = smov [#allocation13]   ;;  %s1550_s27 = smov [#allocation16]  }
  0x51   :  { %s108_s26 = sshll.u32 %s1549_s25, 4  ;;  %s136_s2 = sshll.u32 %s1550_s27, 4  ;;  %s109_s26 = int_to_ptr.vmem [resolvable:$true] %s108_s26  ;;  %s137_s2 = int_to_ptr.vmem [resolvable:$true] %s136_s2 }
  0x52   :  { %s1476_s8 = scalar_lea.vmem %s109_s26, 1024  ;;  %p1481_p8 = scmp.lt.s32.totalorder %s109_s26, %s109_s26 }
  0x53   :  { %p1477_p7 = scmp.ne.s32.totalorder %s109_s26, %s1476_s8  ;;  %p1482_p9 = scmp.lt.s32.totalorder %s1476_s8, %s1476_s8 }
  0x55   :  { %p1483_p10 = por %p1482_p9, %p1481_p8 }
  0x57   :  { %p1484_p11 = pnand %p1483_p10, %p1477_p7 }
  0x59   :  { %1487 = shalt.err (!%p1484_p11)
}
  0x5a   :  { %114 = dma.hbm_to_vmem [thread:$0]  %s1791_s10, 1024, %s109_s26, [#allocation12], %s1543_s0, %s1543_s0, %s1544_s17  }
  0x5b   :  { %s1496_s6 = scalar_lea.vmem %s137_s2, 1024  ;;  %p1501_p13 = scmp.lt.s32.totalorder %s137_s2, %s137_s2 }
  0x5c   :  { %p1497_p12 = scmp.ne.s32.totalorder %s137_s2, %s1496_s6  ;;  %p1502_p0 = scmp.lt.s32.totalorder %s1496_s6, %s1496_s6 }
  0x5e   :  { %p1503_p1 = por %p1502_p0, %p1501_p13 }
  0x60   :  { %p1504_p2 = pnand %p1503_p1, %p1497_p12 }
  0x62   :  { %1507 = shalt.err (!%p1504_p2)
}
  0x63   :  { %142 = dma.hbm_to_vmem [thread:$0]  %s1795_s14, 1024, %s137_s2, [#allocation15], %s1543_s0, %s1543_s0, %s1544_s17  }
  0x64   :  { %1528 = dma.done.wait [#allocation3], 64  }
  0x65   :  { %1529 = vsyncadd [#allocation3], 4294967232 }
  0x66   :  { %1530 = dma.done.wait [#allocation6], 1088  }
  0x67   :  { %1531 = vsyncadd [#allocation6], 4294966208 }
  0x68   :  { %1532 = dma.done.wait [#allocation9], 2048  }
  0x69   :  { %1533 = vsyncadd [#allocation9], 4294965248 }
  0x6a   :  { %1534 = dma.done.wait [#allocation12], 2048  }
  0x6b   :  { %1535 = vsyncadd [#allocation12], 4294965248 }
  0x6c   :  { %1536 = dma.done.wait [#allocation15], 2048  }
  0x6d   :  { %1537 = vsyncadd [#allocation15], 4294965248  ;;  %v1551_v0 = vmov 0.0   ;;  %vm1552_vm0 = vmmov 0   ;;  %v1270_v1 = vld [vmem:[#allocation7 + $0x38] sm:$0xff]   ;;  %v1271_v2 = vld [vmem:[#allocation7 + $0x30] sm:$0xff]  }
  0x6e   :  { %1116 = vmatprep.subr.bf16.mxu0 %v1551_v0  ;;  %1132 = vmatprep.mubr.msk.bf16.mxu0 %vm1552_vm0, %v1551_v0  ;;  %v1272_v3 = vld [vmem:[#allocation7 + $0x28] sm:$0xff]   ;;  %v1278_v4 = vld [vmem:[#allocation8 + $0x38] sm:$0xff]   ;;  %v1273_v5 = vld [vmem:[#allocation7 + $0x20] sm:$0xff]   ;;  %s1553_s22 = smov [#allocation17]  }
  0x6f   :  { %1136 = vmatprep.subr.bf16.mxu1 %v1551_v0  ;;  %1152 = vmatprep.mubr.msk.bf16.mxu1 %vm1552_vm0, %v1551_v0  ;;  %v1279_v6 = vld [vmem:[#allocation8 + $0x30] sm:$0xff]   ;;  %v1274_v7 = vld [vmem:[#allocation7 + $0x18] sm:$0xff]   ;;  %v1280_v8 = vld [vmem:[#allocation8 + $0x28] sm:$0xff]   ;;  %s977_s23 = sshll.u32 %s1553_s22, 4  ;;  %s978_s23 = int_to_ptr.vmem [resolvable:$true] %s977_s23 }
  0x70   :  { %1117 = vmatpush3.bf16.msra.mxu0 %v1270_v1  ;;  %1137 = vmatpush3.bf16.msra.mxu1 %v1278_v4  ;;  %v1275_v9 = vld [vmem:[#allocation7 + $0x10] sm:$0xff]   ;;  %v1281_v10 = vld [vmem:[#allocation8 + $0x20] sm:$0xff]   ;;  %v1276_v11 = vld [vmem:[#allocation7 + $0x8] sm:$0xff]   ;;  %p1513_p4 = scmp.lt.s32.totalorder %s978_s23, %s978_s23 }
  0x71   :  { %1118 = vmatprep.subr.bf16.mxu0 %v1551_v0  ;;  %1138 = vmatprep.subr.bf16.mxu1 %v1551_v0  ;;  %v1282_v12 = vld [vmem:[#allocation8 + $0x18] sm:$0xff]   ;;  %v1277_v13 = vld [vmem:[#allocation7] sm:$0xff]   ;;  %v1283_v14 = vld [vmem:[#allocation8 + $0x10] sm:$0xff]  }
  0x72   :  { %v173_v15 = vld [vmem:[#allocation2] sm:$0xf]  ;;  %v1284_v16 = vld [vmem:[#allocation8 + $0x8] sm:$0xff]   ;;  %v1285_v17 = vld [vmem:[#allocation8] sm:$0xff]  }
  0x73   :  { %v1286_v18 = vld [vmem:[#allocation10 + $0x38] sm:$0xff]   ;;  %v1288_v19 = vld [vmem:[#allocation10 + $0x30] sm:$0xff]   ;;  %v1290_v20 = vld [vmem:[#allocation10 + $0x28] sm:$0xff]  }
  0x74   :  { %1119 = vmatpush3.bf16.msra.mxu0 %v1271_v2  ;;  %1139 = vmatpush3.bf16.msra.mxu1 %v1279_v6  ;;  %v1292_v21 = vld [vmem:[#allocation10 + $0x20] sm:$0xff]   ;;  %v1294_v22 = vld [vmem:[#allocation10 + $0x18] sm:$0xff]   ;;  %v1296_v23 = vld [vmem:[#allocation10 + $0x10] sm:$0xff]  }
  0x75   :  { %1120 = vmatprep.subr.bf16.mxu0 %v1551_v0  ;;  %1140 = vmatprep.subr.bf16.mxu1 %v1551_v0  ;;  %v990_v24 = vld [vmem:[%s1784_s3] ss:$0 sm:$0xff]  ;;  %v1289_v33 = vld [vmem:[#allocation11 + $0x30] sm:$0xff]   ;;  %v1291_v34 = vld [vmem:[#allocation11 + $0x28] sm:$0xff]  }
  0x76   :  { %v1287_v30 = vld [vmem:[#allocation11 + $0x38] sm:$0xff]   ;;  %v1293_v35 = vld [vmem:[#allocation11 + $0x20] sm:$0xff]   ;;  %v1297_v37 = vld [vmem:[#allocation11 + $0x10] sm:$0xff]  }
  0x77   :  { %v1295_v36 = vld [vmem:[#allocation11 + $0x18] sm:$0xff]   ;;  %v1298_v38 = vld [vmem:[#allocation10 + $0x8] sm:$0xff]   ;;  %v1300_v40 = vld [vmem:[#allocation10] sm:$0xff]  }
  0x78   :  { %1121 = vmatpush3.bf16.msra.mxu0 %v1272_v3  ;;  %1141 = vmatpush3.bf16.msra.mxu1 %v1280_v8  ;;  %v1299_v39 = vld [vmem:[#allocation11 + $0x8] sm:$0xff]   ;;  %v1301_v41 = vld [vmem:[#allocation11] sm:$0xff]   ;;  %v999_v42 = vld [vmem:[%s1786_s5] ss:$0 sm:$0xff] }
  0x79   :  { %1122 = vmatprep.subr.bf16.mxu0 %v1551_v0  ;;  %1142 = vmatprep.subr.bf16.mxu1 %v1551_v0  ;;  %v1302_v48 = vld [vmem:[#allocation13 + $0x38] sm:$0xff]   ;;  %v1303_v51 = vld [vmem:[#allocation13 + $0x30] sm:$0xff]   ;;  %v1304_v52 = vld [vmem:[#allocation13 + $0x28] sm:$0xff]  }
  0x7a   :  { %v1305_v53 = vld [vmem:[#allocation13 + $0x20] sm:$0xff]   ;;  %v1306_v54 = vld [vmem:[#allocation13 + $0x18] sm:$0xff]   ;;  %v1307_v55 = vld [vmem:[#allocation13 + $0x10] sm:$0xff]  }
  0x7b   :  { %v1308_v56 = vld [vmem:[#allocation13 + $0x8] sm:$0xff]   ;;  %v1309_v57 = vld [vmem:[#allocation13] sm:$0xff]   ;;  %v1310_v58 = vld [vmem:[#allocation14 + $0x38] sm:$0xff]  }
  0x7c   :  { %1123 = vmatpush3.bf16.msra.mxu0 %v1273_v5  ;;  %1143 = vmatpush3.bf16.msra.mxu1 %v1281_v10  ;;  %v1311_v59 = vld [vmem:[#allocation14 + $0x30] sm:$0xff]   ;;  %v1312_v60 = vld [vmem:[#allocation14 + $0x28] sm:$0xff]   ;;  %v1313_v61 = vld [vmem:[#allocation14 + $0x20] sm:$0xff]  }
  0x7d   :  { %1124 = vmatprep.subr.bf16.mxu0 %v1551_v0  ;;  %1144 = vmatprep.subr.bf16.mxu1 %v1551_v0  ;;  %v1314_v62 = vld [vmem:[#allocation14 + $0x18] sm:$0xff]   ;;  %v1315_v63 = vld [vmem:[#allocation14 + $0x10] sm:$0xff]  }
  0x7e   :  { %v1008_v1 = vld [vmem:[%s1788_s7] ss:$0 sm:$0xff] }
  0x7f   :  { %v1017_v2 = vld [vmem:[%s1790_s9] ss:$0 sm:$0xff] }
  0x80   :  { %1125 = vmatpush3.bf16.msra.mxu0 %v1274_v7  ;;  %1145 = vmatpush3.bf16.msra.mxu1 %v1282_v12 }
  0x81   :  { %1126 = vmatprep.subr.bf16.mxu0 %v1551_v0  ;;  %1146 = vmatprep.subr.bf16.mxu1 %v1551_v0 }
  0x84   :  { %1127 = vmatpush3.bf16.msra.mxu0 %v1275_v9  ;;  %1147 = vmatpush3.bf16.msra.mxu1 %v1283_v14 }
  0x85   :  { %1128 = vmatprep.subr.bf16.mxu0 %v1551_v0  ;;  %1148 = vmatprep.subr.bf16.mxu1 %v1551_v0 }
  0x88   :  { %1129 = vmatpush3.bf16.msra.mxu0 %v1276_v11  ;;  %1149 = vmatpush3.bf16.msra.mxu1 %v1284_v16 }
  0x89   :  { %1130 = vmatprep.subr.bf16.mxu0 %v1551_v0  ;;  %1150 = vmatprep.subr.bf16.mxu1 %v1551_v0 }
  0x8c   :  { %1131 = vmatpush3.bf16.msra.mxu0 %v1277_v13  ;;  %1151 = vmatpush3.bf16.msra.mxu1 %v1285_v17 }
  0x8d   :  { %1156 = vmatprep.subr.bf16.mxu0 %v1551_v0  ;;  %1176 = vmatprep.subr.bf16.mxu1 %v1551_v0 }
  0x8f   :  { %1133 = vmatmul.mubr.bf16.vlgmr.msra.gmra.mxu0 %v173_v15  ;;  %v625_v15 = vld [vmem:[#allocation5] sm:$0xf] }
  0x90   :  { %1172 = vmatprep.mubr.msk.bf16.mxu0 %vm1552_vm0, %v1551_v0  ;;  %1157 = vmatpush3.bf16.msra.mxu0 %v1286_v18  ;;  %v626_v16 = vunpack.c.l.bf16 %v625_v15 }
  0x91   :  { %1158 = vmatprep.subr.bf16.mxu0 %v1551_v0 }
  0x94   :  { %1159 = vmatpush3.bf16.msra.mxu0 %v1288_v19 }
  0x95   :  { %1160 = vmatprep.subr.bf16.mxu0 %v1551_v0 }
  0x98   :  { %1161 = vmatpush3.bf16.msra.mxu0 %v1290_v20 }
  0x99   :  { %1162 = vmatprep.subr.bf16.mxu0 %v1551_v0 }
  0x9c   :  { %1163 = vmatpush3.bf16.msra.mxu0 %v1292_v21  ;;  %v1316_v21 = vld [vmem:[#allocation14 + $0x8] sm:$0xff]  }
  0x9d   :  { %1164 = vmatprep.subr.bf16.mxu0 %v1551_v0 }
  0xa0   :  { %1165 = vmatpush3.bf16.msra.mxu0 %v1294_v22  ;;  %v1317_v22 = vld [vmem:[#allocation14] sm:$0xff]  }
  0xa1   :  { %1166 = vmatprep.subr.bf16.mxu0 %v1551_v0 }
  0xa4   :  { %1167 = vmatpush3.bf16.msra.mxu0 %v1296_v23  ;;  %v1318_v23 = vld [vmem:[#allocation16 + $0x38] sm:$0xff]  }
  0xa5   :  { %1168 = vmatprep.subr.bf16.mxu0 %v1551_v0 }
  0xa8   :  { %1169 = vmatpush3.bf16.msra.mxu0 %v1298_v38  ;;  %v1325_v38 = vld [vmem:[#allocation16] sm:$0xff]  }
  0xa9   :  { %1170 = vmatprep.subr.bf16.mxu0 %v1551_v0 }
  0xac   :  { %1171 = vmatpush3.bf16.msra.mxu0 %v1300_v40 }
  0xad   :  { %1196 = vmatprep.subr.bf16.mxu0 %v1551_v0 }
 0x14f   :  { %v279_v25 = vpop.f32.mrf.mxu0 }
 0x150   :  { %v280_v26 = vadd.f32 %v990_v24, %v279_v25  ;;  %v1319_v24 = vld [vmem:[#allocation16 + $0x30] sm:$0xff]   ;;  %v1320_v25 = vld [vmem:[#allocation16 + $0x28] sm:$0xff]  }
 0x151   :  { %v1134_v27 = vpop.f32.mrf.mxu0 }
 0x152   :  { %v285_v28 = vmax.f32 %v280_v26, 0.0  ;;  %v1321_v26 = vld [vmem:[#allocation16 + $0x20] sm:$0xff]   ;;  %v1322_v27 = vld [vmem:[#allocation16 + $0x18] sm:$0xff]  }
 0x153   :  { %v282_v29 = vpop.f32.mrf.mxu0 }
 0x154   :  { %v286_v31 = vpack.c.bf16 %v285_v28, %v285_v28  ;;  %v1323_v28 = vld [vmem:[#allocation16 + $0x10] sm:$0xff]   ;;  %v1026_v29 = vld [vmem:[%s1792_s11] ss:$0 sm:$0xff] }
 0x155   :  { %v1135_v32 = vpop.f32.mrf.mxu0 }
 0x156   :  { %1153 = vmatmul.mubr.bf16.vlgmr.msra.gmra.mxu1 %v286_v31 }
 0x157   :  { %1177 = vmatpush3.bf16.msra.mxu1 %v1287_v30  ;;  %1192 = vmatprep.mubr.msk.bf16.mxu1 %vm1552_vm0, %v1551_v0 }
 0x158   :  { %1178 = vmatprep.subr.bf16.mxu1 %v1551_v0 }
 0x15b   :  { %1179 = vmatpush3.bf16.msra.mxu1 %v1289_v33 }
 0x15c   :  { %1180 = vmatprep.subr.bf16.mxu1 %v1551_v0 }
 0x15f   :  { %1181 = vmatpush3.bf16.msra.mxu1 %v1291_v34 }
 0x160   :  { %1182 = vmatprep.subr.bf16.mxu1 %v1551_v0 }
 0x163   :  { %1183 = vmatpush3.bf16.msra.mxu1 %v1293_v35 }
 0x164   :  { %1184 = vmatprep.subr.bf16.mxu1 %v1551_v0 }
 0x167   :  { %1185 = vmatpush3.bf16.msra.mxu1 %v1295_v36 }
 0x168   :  { %1186 = vmatprep.subr.bf16.mxu1 %v1551_v0 }
 0x16b   :  { %1187 = vmatpush3.bf16.msra.mxu1 %v1297_v37  ;;  %v1324_v37 = vld [vmem:[#allocation16 + $0x8] sm:$0xff]  }
 0x16c   :  { %1188 = vmatprep.subr.bf16.mxu1 %v1551_v0 }
 0x16f   :  { %1189 = vmatpush3.bf16.msra.mxu1 %v1299_v39  ;;  %v1035_v39 = vld [vmem:[%s1794_s13] ss:$0 sm:$0xff]  ;;  %s1508_s13 = scalar_lea.vmem %s978_s23, 512 }
 0x170   :  { %1190 = vmatprep.subr.bf16.mxu1 %v1551_v0  ;;  %p1509_p3 = scmp.ne.s32.totalorder %s978_s23, %s1508_s13  ;;  %p1514_p5 = scmp.lt.s32.totalorder %s1508_s13, %s1508_s13 }
 0x172   :  { %p1515_p6 = por %p1514_p5, %p1513_p4 }
 0x173   :  { %1191 = vmatpush3.bf16.msra.mxu1 %v1301_v41 }
 0x174   :  { %1216 = vmatprep.subr.bf16.mxu1 %v1551_v0  ;;  %p1516_p7 = pnand %p1515_p6, %p1509_p3 }
 0x216   :  { %v392_v43 = vpop.f32.mrf.mxu1 }
 0x217   :  { %v393_v44 = vadd.f32 %v999_v42, %v392_v43 }
 0x218   :  { %v1154_v45 = vpop.f32.mrf.mxu1 }
 0x219   :  { %v398_v46 = vmax.f32 %v393_v44, 0.0 }
 0x21a   :  { %v395_v47 = vpop.f32.mrf.mxu1 }
 0x21b   :  { %v399_v49 = vpack.c.bf16 %v398_v46, %v398_v46  ;;  %v1044_v47 = vld [vmem:[%s1796_s15] ss:$0 sm:$0xff] }
 0x21c   :  { %v1155_v50 = vpop.f32.mrf.mxu1 }
 0x21d   :  { %1173 = vmatmul.mubr.bf16.vlgmr.msra.gmra.mxu0 %v399_v49  ;;  %1193 = vmatmul.mubr.bf16.vlgmr.msra.gmra.mxu1 %v399_v49 }
 0x21e   :  { %1197 = vmatpush3.bf16.msra.mxu0 %v1302_v48  ;;  %1212 = vmatprep.mubr.msk.bf16.mxu0 %vm1552_vm0, %v1551_v0 }
 0x21f   :  { %1198 = vmatprep.subr.bf16.mxu0 %v1551_v0  ;;  %1232 = vmatprep.mubr.msk.bf16.mxu1 %vm1552_vm0, %v1551_v0 }
 0x220   :  { %1217 = vmatpush3.bf16.msra.mxu1 %v1310_v58 }
 0x221   :  { %1218 = vmatprep.subr.bf16.mxu1 %v1551_v0 }
 0x222   :  { %1199 = vmatpush3.bf16.msra.mxu0 %v1303_v51 }
 0x223   :  { %1200 = vmatprep.subr.bf16.mxu0 %v1551_v0 }
 0x224   :  { %1219 = vmatpush3.bf16.msra.mxu1 %v1311_v59 }
 0x225   :  { %1220 = vmatprep.subr.bf16.mxu1 %v1551_v0 }
 0x226   :  { %1201 = vmatpush3.bf16.msra.mxu0 %v1304_v52 }
 0x227   :  { %1202 = vmatprep.subr.bf16.mxu0 %v1551_v0 }
 0x228   :  { %1221 = vmatpush3.bf16.msra.mxu1 %v1312_v60 }
 0x229   :  { %1222 = vmatprep.subr.bf16.mxu1 %v1551_v0 }
 0x22a   :  { %1203 = vmatpush3.bf16.msra.mxu0 %v1305_v53 }
 0x22b   :  { %1204 = vmatprep.subr.bf16.mxu0 %v1551_v0 }
 0x22c   :  { %1223 = vmatpush3.bf16.msra.mxu1 %v1313_v61 }
 0x22d   :  { %1224 = vmatprep.subr.bf16.mxu1 %v1551_v0 }
 0x22e   :  { %1205 = vmatpush3.bf16.msra.mxu0 %v1306_v54 }
 0x22f   :  { %1206 = vmatprep.subr.bf16.mxu0 %v1551_v0 }
 0x230   :  { %1225 = vmatpush3.bf16.msra.mxu1 %v1314_v62 }
 0x231   :  { %1226 = vmatprep.subr.bf16.mxu1 %v1551_v0 }
 0x232   :  { %1207 = vmatpush3.bf16.msra.mxu0 %v1307_v55 }
 0x233   :  { %1208 = vmatprep.subr.bf16.mxu0 %v1551_v0 }
 0x234   :  { %1227 = vmatpush3.bf16.msra.mxu1 %v1315_v63 }
 0x235   :  { %1228 = vmatprep.subr.bf16.mxu1 %v1551_v0 }
 0x236   :  { %1209 = vmatpush3.bf16.msra.mxu0 %v1308_v56 }
 0x237   :  { %1210 = vmatprep.subr.bf16.mxu0 %v1551_v0 }
 0x238   :  { %1229 = vmatpush3.bf16.msra.mxu1 %v1316_v21 }
 0x239   :  { %1230 = vmatprep.subr.bf16.mxu1 %v1551_v0 }
 0x23a   :  { %1211 = vmatpush3.bf16.msra.mxu0 %v1309_v57 }
 0x23b   :  { %1236 = vmatprep.subr.bf16.mxu0 %v1551_v0 }
 0x23c   :  { %1231 = vmatpush3.bf16.msra.mxu1 %v1317_v22 }
 0x2dd   :  { %v505_v3 = vpop.f32.mrf.mxu0  ;;  %v616_v4 = vpop.f32.mrf.mxu1 }
 0x2de   :  { %v506_v5 = vadd.f32 %v1008_v1, %v505_v3  ;;  %v617_v6 = vadd.f32 %v1017_v2, %v616_v4 }
 0x2df   :  { %v1174_v7 = vpop.f32.mrf.mxu0  ;;  %v1194_v8 = vpop.f32.mrf.mxu1 }
 0x2e0   :  { %968 = vst [vmem:[#allocation17 + $0x8] sm:$0xff] %v506_v5  ;;  %v622_v9 = vmul.f32 0.5, %v617_v6  ;;  %970 = vst [vmem:[#allocation17 + $0x18] sm:$0xff] %v617_v6 }
 0x2e1   :  { %v508_v10 = vpop.f32.mrf.mxu0  ;;  %v619_v11 = vpop.f32.mrf.mxu1 }
 0x2e2   :  { %v623_v12 = vmul.f32 1.442695, %v622_v9 }
 0x2e3   :  { %v1175_v13 = vpop.f32.mrf.mxu0  ;;  %v1195_v14 = vpop.f32.mrf.mxu1 }
 0x2e4   :  { %1326 = vpow2.f32 %v623_v12 }
 0x2f1   :  { %v1327_v17 = vpop.eup %1326 }
 0x2f2   :  { %969 = vst [vmem:[#allocation17 + $0x10] sm:$0xff] %v1327_v17  ;;  %v627_v18 = vmul.f32 %v1327_v17, %v626_v16 }
 0x2f4   :  { %v628_v19 = vadd.f32 %v627_v18, %v506_v5 }
 0x2f6   :  { %v629_v20 = vpack.c.bf16 %v628_v19, %v628_v19 }
 0x2f8   :  { %1213 = vmatmul.mubr.bf16.vlgmr.msra.gmra.mxu0 %v629_v20 }
 0x2f9   :  { %1252 = vmatprep.mubr.msk.bf16.mxu0 %vm1552_vm0, %v1551_v0  ;;  %1237 = vmatpush3.bf16.msra.mxu0 %v1318_v23 }
 0x2fa   :  { %1238 = vmatprep.subr.bf16.mxu0 %v1551_v0 }
 0x2fd   :  { %1239 = vmatpush3.bf16.msra.mxu0 %v1319_v24 }
 0x2fe   :  { %1240 = vmatprep.subr.bf16.mxu0 %v1551_v0 }
 0x301   :  { %1241 = vmatpush3.bf16.msra.mxu0 %v1320_v25 }
 0x302   :  { %1242 = vmatprep.subr.bf16.mxu0 %v1551_v0 }
 0x305   :  { %1243 = vmatpush3.bf16.msra.mxu0 %v1321_v26 }
 0x306   :  { %1244 = vmatprep.subr.bf16.mxu0 %v1551_v0 }
 0x309   :  { %1245 = vmatpush3.bf16.msra.mxu0 %v1322_v27 }
 0x30a   :  { %1246 = vmatprep.subr.bf16.mxu0 %v1551_v0 }
 0x30d   :  { %1247 = vmatpush3.bf16.msra.mxu0 %v1323_v28 }
 0x30e   :  { %1248 = vmatprep.subr.bf16.mxu0 %v1551_v0 }
 0x311   :  { %1249 = vmatpush3.bf16.msra.mxu0 %v1324_v37 }
 0x312   :  { %1250 = vmatprep.subr.bf16.mxu0 %v1551_v0 }
 0x315   :  { %1251 = vmatpush3.bf16.msra.mxu0 %v1325_v38 }
 0x3b8   :  { %v735_v30 = vpop.f32.mrf.mxu0 }
 0x3b9   :  { %v736_v31 = vadd.f32 %v1026_v29, %v735_v30 }
 0x3ba   :  { %v1214_v32 = vpop.f32.mrf.mxu0 }
 0x3bb   :  { %v741_v33 = vmax.f32 %v736_v31, 0.0 }
 0x3bc   :  { %v738_v34 = vpop.f32.mrf.mxu0 }
 0x3bd   :  { %v742_v35 = vpack.c.bf16 %v741_v33, %v741_v33 }
 0x3be   :  { %v1215_v36 = vpop.f32.mrf.mxu0 }
 0x3bf   :  { %1233 = vmatmul.mubr.bf16.vlgmr.msra.gmra.mxu1 %v742_v35 }
 0x47f   :  { %v848_v40 = vpop.f32.mrf.mxu1 }
 0x480   :  { %v849_v41 = vadd.f32 %v1035_v39, %v848_v40 }
 0x481   :  { %v1234_v42 = vpop.f32.mrf.mxu1 }
 0x482   :  { %v854_v43 = vmax.f32 %v849_v41, 0.0 }
 0x483   :  { %v851_v44 = vpop.f32.mrf.mxu1 }
 0x484   :  { %v855_v45 = vpack.c.bf16 %v854_v43, %v854_v43 }
 0x485   :  { %v1235_v46 = vpop.f32.mrf.mxu1 }
 0x486   :  { %1253 = vmatmul.mubr.bf16.vlgmr.msra.gmra.mxu0 %v855_v45 }
 0x546   :  { %v961_v0 = vpop.f32.mrf.mxu0 }
 0x547   :  { %v962_v48 = vadd.f32 %v1044_v47, %v961_v0 }
 0x548   :  { %v1254_v49 = vpop.f32.mrf.mxu0 }
 0x549   :  { %967 = vst [vmem:[#allocation17] sm:$0xff] %v962_v48 }
 0x54a   :  { %v964_v50 = vpop.f32.mrf.mxu0 }
 0x54b   :  { %1519 = shalt.err (!%p1516_p7)
}
 0x54c   :  { %980 = dma.vmem_to_hbm [thread:$0]  %s978_s23, 512, %s1797_s16, [#allocation4]   ;;  %v1255_v51 = vpop.f32.mrf.mxu0 }
 0x54d   :  { %1538 = dma.done.wait [#allocation4], 512  }
 0x54e   :  { %1539 = vsyncadd [#allocation4], 4294966784 }
 0x54f   :  { %984 = vsyncpa [#allocation3], 1 }
 0x550   :  { %985 = vsyncpa [#allocation6], 1 }
 0x551   :  { %986 = vsyncpa [#allocation9], 1 }
 0x552   :  { %987 = vsyncpa [#allocation12], 1 }
 0x553   :  { %988 = vsyncpa [#allocation15], 1 }
 0x554   :  { %989 = vsyncpa [#allocation4], 1 }

</bundles_post_ra>
